<compile_context>
chip_gen: v6e
topology: v6e:2x2x1
jax: 0.10.0
libtpu: 0.0.40
codegen_flags: <defaults>
</compile_context>

<pallas_src>
import jax
import jax.numpy as jnp
from jax import lax
from jax.experimental import pallas as pl
from jax.experimental.pallas import tpu as pltpu

EPS = 1e-5


def _elu(y):
    # ELU(alpha=1): y if y > 0 else exp(y) - 1   (overflow-guarded)
    return jnp.where(y > 0, y, jnp.exp(jnp.minimum(y, 0.0)) - 1.0)


def _round_up(v, m):
    return -(-v // m) * m


def _pad2(a, rows, cols):
    return jnp.pad(a, ((0, rows - a.shape[0]), (0, cols - a.shape[1])))


def _pad_col(v, rows):
    return jnp.pad(v, (0, rows - v.shape[0])).reshape(rows, 1).astype(jnp.float32)


_ROLL_MATCHES_JNP = None


def _roll_matches_jnp():
    """True iff pltpu.roll(x, s)[..., t] == x[..., (t - s) % n] (jnp.roll convention)."""
    global _ROLL_MATCHES_JNP
    if _ROLL_MATCHES_JNP is None:
        def kern(x_ref, o_ref):
            o_ref[...] = pltpu.roll(x_ref[...], shift=1, axis=1)
        x = jnp.broadcast_to(jnp.arange(128, dtype=jnp.float32), (8, 128))
        y = pl.pallas_call(kern, out_shape=jax.ShapeDtypeStruct((8, 128), jnp.float32))(x)
        _ROLL_MATCHES_JNP = bool(jax.device_get(y[0, 1]) == 0.0)
    return _ROLL_MATCHES_JNP


def _hw_budgets():
    """(lane-tile cap, scoped-VMEM request).  Conservative on v7x (64 MiB VMEM/TC)."""
    try:
        kind = jax.devices()[0].device_kind.lower()
    except Exception:
        kind = ""
    big_vmem = any(t in kind for t in ("v2", "v3", "v4", "v5", "v6"))
    return (8192, 96 << 20) if big_vmem else (4096, 48 << 20)


def _pick_samples_per_tile(N, L_p, target_lanes):
    """Largest divisor d of N with d*L_p <= target_lanes, preferring >= 2 tiles."""
    best = 1
    for d in range(1, N + 1):
        if d * L_p > target_lanes:
            break
        if N % d:
            continue
        if N >= 2 and (N // d) < 2:     # keep the grid parallel across 2 TensorCores
            continue
        best = d
    return best


def encoder_bottleneck_forward(x, params, lengths, *, compute_dtype=jnp.bfloat16):
    """x: (N, C_in, L) float32, NCL like PyTorch.  Returns (N, 4*C_out, L)."""
    N, C_in, L = x.shape
    NL = N * L
    C_mid = params["w1"].shape[0]
    C_out = params["w3"].shape[0]
    assert C_out == C_in, "identity skip requires in_channels == 4*out_channels"

    # channel (sublane) padding: 16 for bf16 native tiling, 8 for f32
    sub = 16 if jnp.dtype(compute_dtype) == jnp.dtype(jnp.bfloat16) else 8
    C_in_p, C_mid_p, C_out_p = (_round_up(c, sub) for c in (C_in, C_mid, C_out))
    L_p = _round_up(L, 128)              # lane-aligned per-sample length
    NLp = N * L_p

    lane_cap, vmem_limit = _hw_budgets()
    per_lane_bytes = 4 * (C_in_p + C_out_p + 10 * C_mid_p)   # generous f32 accounting
    budget = max(2 << 20, vmem_limit // 4)
    target_lanes = max(128, min(lane_cap, (budget // per_lane_bytes) // 128 * 128))
    spt = _pick_samples_per_tile(N, L_p, target_lanes)
    # TODO(synk): a single extremely long sample (L_p >> target_lanes) would need an
    # intra-sample halo split; tiles are whole samples here.
    T = spt * L_p
    n_tiles = NLp // T

    inter_dtype = compute_dtype          # inter-stage activations (bf16 halves HBM traffic)

    # layout: (N, C, L) -> channels-major (C, N*L_p); zero padding on C and L.
    # TODO(synk): when chaining bottleneck blocks, hoist this transpose/pad (and the
    # inverse at the end) out of the block so it happens once per network.
    xp = jnp.pad(x.astype(jnp.float32), ((0, 0), (0, C_in_p - C_in), (0, L_p - L)))
    x2p = jnp.transpose(xp, (1, 0, 2)).reshape(C_in_p, NLp)

    # weights (conv biases dropped: exactly cancelled by the BN mean subtraction)
    w1p = _pad2(params["w1"], C_mid_p, C_in_p).astype(compute_dtype)
    w2p = jnp.pad(params["w2"], ((0, C_mid_p - C_mid), (0, C_mid_p - C_mid), (0, 0)))
    w2s = jnp.concatenate([w2p[:, :, 0], w2p[:, :, 1], w2p[:, :, 2]], axis=0)
    w2s = w2s.astype(compute_dtype)                 # (3C, C): [prev; center; next] taps
    w3p = _pad2(params["w3"], C_out_p, C_mid_p).astype(compute_dtype)
    w3f = _pad2(params["w3"], C_out_p, C_mid_p).astype(jnp.float32)

    g1, be1 = _pad_col(params["g1"], C_mid_p), _pad_col(params["be1"], C_mid_p)
    g2, be2 = _pad_col(params["g2"], C_mid_p), _pad_col(params["be2"], C_mid_p)
    g3, be3 = _pad_col(params["g3"], C_out_p), _pad_col(params["be3"], C_out_p)

    # per-sample conv-boundary / validity masks (identical for every tile -> resident)
    col = jnp.arange(T, dtype=jnp.int32) % L_p
    masks = jnp.zeros((8, T), jnp.float32)
    masks = masks.at[0].set((col != 0).astype(jnp.float32))         # prev-tap valid
    masks = masks.at[1].set((col != (L - 1)).astype(jnp.float32))   # next-tap valid
    masks = masks.at[2].set((col < L).astype(jnp.float32))          # real (unpadded) column

    # temporal +/-1 shifts on the XLU (pltpu.roll requires non-negative shifts)
    prev_shift, next_shift = (1, T - 1) if _roll_matches_jnp() else (T - 1, 1)

    # block specs
    act_spec = lambda C: pl.BlockSpec((C, T), lambda i: (0, i))
    res_spec = lambda r, c: pl.BlockSpec((r, c), lambda i: (0, 0))   # VMEM-resident
    st_spec = lambda C: pl.BlockSpec((C, 2), lambda i: (i, 0))       # per-tile stats
    gram_spec = pl.BlockSpec((C_mid_p, C_mid_p), lambda i: (i, 0))

    cparams = pltpu.CompilerParams(
        dimension_semantics=("parallel",), vmem_limit_bytes=vmem_limit)

    def _stats(z):   # z: (C, T) f32 -> (C, 2) = [sum, sum_of_squares]
        return jnp.concatenate(
            [jnp.sum(z, axis=1, keepdims=True),
             jnp.sum(z * z, axis=1, keepdims=True)], axis=1)

    def _fold_bn(pstats, gamma, beta, C):
        # NOTE: one-pass E[x^2]-E[x]^2 in f32 (fine for activation-scale data).
        tot = pstats.reshape(n_tiles, C, 2).sum(axis=0)
        mean = tot[:, 0:1] / NL
        var = jnp.maximum(tot[:, 1:2] / NL - mean * mean, 0.0)
        scale = gamma * lax.rsqrt(var + EPS)
        return scale, beta - mean * scale

    # ---------------- stage 1: conv1 (1x1) + BN1 partial stats ----------------
    def stage1_kernel(x_ref, w_ref, z_ref, st_ref):
        z = jnp.dot(w_ref[...], x_ref[...].astype(compute_dtype),
                    preferred_element_type=jnp.float32)
        z_ref[...] = z.astype(z_ref.dtype)
        st_ref[...] = _stats(z)          # L-padding columns are exactly zero here

    z1, ps1 = pl.pallas_call(
        stage1_kernel,
        grid=(n_tiles,),
        in_specs=[act_spec(C_in_p), res_spec(C_mid_p, C_in_p)],
        out_specs=[act_spec(C_mid_p), st_spec(C_mid_p)],
        out_shape=[jax.ShapeDtypeStruct((C_mid_p, NLp), inter_dtype),
                   jax.ShapeDtypeStruct((n_tiles * C_mid_p, 2), jnp.float32)],
        compiler_params=cparams,
    )(x2p, w1p)
    sc1, sh1 = _fold_bn(ps1, g1, be1, C_mid_p)

    # ------ stage 2: BN1+ELU, conv2 (k=3,pad=1) as 3 fused taps, BN2 stats ----
    def stage2_kernel(z1_ref, sc_ref, sh_ref, w_ref, m_ref, z2_ref, st_ref):
        C = C_mid_p
        h = _elu(z1_ref[...].astype(jnp.float32) * sc_ref[...] + sh_ref[...])
        h_prev = (pltpu.roll(h, shift=prev_shift, axis=1) * m_ref[0:1, :]).astype(compute_dtype)
        h_next = (pltpu.roll(h, shift=next_shift, axis=1) * m_ref[1:2, :]).astype(compute_dtype)
        z2 = jnp.dot(w_ref[0:C, :], h_prev, preferred_element_type=jnp.float32)
        z2 = z2 + jnp.dot(w_ref[C:2 * C, :], h.astype(compute_dtype),
                          preferred_element_type=jnp.float32)
        z2 = z2 + jnp.dot(w_ref[2 * C:3 * C, :], h_next,
                          preferred_element_type=jnp.float32)
        z2 = z2 * m_ref[2:3, :]          # zero the L-padding columns (clean stats)
        z2_ref[...] = z2.astype(z2_ref.dtype)
        st_ref[...] = _stats(z2)

    z2, ps2 = pl.pallas_call(
        stage2_kernel,
        grid=(n_tiles,),
        in_specs=[act_spec(C_mid_p), res_spec(C_mid_p, 1), res_spec(C_mid_p, 1),
                  res_spec(3 * C_mid_p, C_mid_p), res_spec(8, T)],
        out_specs=[act_spec(C_mid_p), st_spec(C_mid_p)],
        out_shape=[jax.ShapeDtypeStruct((C_mid_p, NLp), inter_dtype),
                   jax.ShapeDtypeStruct((n_tiles * C_mid_p, 2), jnp.float32)],
        compiler_params=cparams,
    )(z1, sc1, sh1, w2s, masks)
    sc2, sh2 = _fold_bn(ps2, g2, be2, C_mid_p)

    # ------ stage 3: BN2+ELU -> h2; emit h2, its column sum and Gram h2@h2^T --
    # BN3 statistics are folded from these moments in the wrapper, so the 4x-wide
    # z3 never round-trips HBM.
    def stage3_kernel(z2_ref, sc_ref, sh_ref, m_ref, h2_ref, st_ref, g_ref):
        h2 = _elu(z2_ref[...].astype(jnp.float32) * sc_ref[...] + sh_ref[...])
        h2 = h2 * m_ref[2:3, :]          # zero the L-padding columns
        h2_ref[...] = h2.astype(h2_ref.dtype)
        st_ref[...] = _stats(h2)         # only the sum column is used downstream
        h2c = h2.astype(compute_dtype)
        g_ref[...] = lax.dot_general(h2c, h2c, (((1,), (1,)), ((), ())),
                                     preferred_element_type=jnp.float32)

    h2, ps3, gram = pl.pallas_call(
        stage3_kernel,
        grid=(n_tiles,),
        in_specs=[act_spec(C_mid_p), res_spec(C_mid_p, 1), res_spec(C_mid_p, 1),
                  res_spec(8, T)],
        out_specs=[act_spec(C_mid_p), st_spec(C_mid_p), gram_spec],
        out_shape=[jax.ShapeDtypeStruct((C_mid_p, NLp), inter_dtype),
                   jax.ShapeDtypeStruct((n_tiles * C_mid_p, 2), jnp.float32),
                   jax.ShapeDtypeStruct((n_tiles * C_mid_p, C_mid_p), jnp.float32)],
        compiler_params=cparams,
    )(z2, sc2, sh2, masks)

    # fold BN3 from h2 moments:  mean(z3) = W3 @ mean(h2),  E[z3^2] = diag(W3 G W3^T)/NL
    sum_h2 = ps3.reshape(n_tiles, C_mid_p, 2).sum(axis=0)[:, 0:1]
    G = gram.reshape(n_tiles, C_mid_p, C_mid_p).sum(axis=0)
    mean3 = (w3f @ sum_h2) / NL
    ez3sq = jnp.sum((w3f @ G) * w3f, axis=1, keepdims=True) / NL
    var3 = jnp.maximum(ez3sq - mean3 * mean3, 0.0)
    sc3 = g3 * lax.rsqrt(var3 + EPS)
    sh3 = be3 - mean3 * sc3

    # ------------ stage 4: conv3 (1x1) + BN3 + residual add + ELU -------------
    def stage4_kernel(h2_ref, x_ref, sc_ref, sh_ref, w_ref, o_ref):
        z3 = jnp.dot(w_ref[...], h2_ref[...].astype(compute_dtype),
                     preferred_element_type=jnp.float32)
        y = z3 * sc_ref[...] + sh_ref[...] + x_ref[...].astype(jnp.float32)
        o_ref[...] = _elu(y).astype(o_ref.dtype)

    out2 = pl.pallas_call(
        stage4_kernel,
        grid=(n_tiles,),
        in_specs=[act_spec(C_mid_p), act_spec(C_in_p), res_spec(C_out_p, 1),
                  res_spec(C_out_p, 1), res_spec(C_out_p, C_mid_p)],
        out_specs=act_spec(C_out_p),
        out_shape=jax.ShapeDtypeStruct((C_out_p, NLp), x.dtype),
        compiler_params=cparams,
    )(h2, x2p, sc3, sh3, w3p)

    out = (out2.reshape(C_out_p, N, L_p)[:C_out, :, :L]).transpose(1, 0, 2)  # back to NCL
    lengths.append(out.shape[-1])        # mirrors self.lengths.append(x.shape[-1])
    # TODO(synk): BatchNorm running_mean/running_var buffer updates (training-time
    # side effect) are not implemented; they do not affect the forward output.
    return out


# --------------------------- pure-JAX reference (NCL) ------------------------
def _reference_forward(x, p):
    def conv1d(h, w, b, pad):
        y = jax.lax.conv_general_dilated(
            h, w, window_strides=(1,), padding=[(pad, pad)],
            dimension_numbers=("NCH", "OIH", "NCH"))
        return y + b[None, :, None]

    def bn(h, g, b):
        mean = jnp.mean(h, axis=(0, 2), keepdims=True)
        var = jnp.mean((h - mean) ** 2, axis=(0, 2), keepdims=True)
        return (h - mean) / jnp.sqrt(var + EPS) * g[None, :, None] + b[None, :, None]

    elu = jax.nn.elu
    identity = x
    h = elu(bn(conv1d(x, p["w1"][:, :, None], p["b1"], 0), p["g1"], p["be1"]))
    h = elu(bn(conv1d(h, p["w2"], p["b2"], 1), p["g2"], p["be2"]))
    h = bn(conv1d(h, p["w3"][:, :, None], p["b3"], 0), p["g3"], p["be3"])
    return elu(h + identity)


def _init_params(key, in_channels, out_channels):
    expansion = 4
    c1, c3 = out_channels, out_channels * expansion
    ks = jax.random.split(key, 12)
    n = lambda k, shape, s: (jax.random.normal(k, shape, jnp.float32) * s)
    return {
        "w1": n(ks[0], (c1, in_channels), 0.2), "b1": n(ks[1], (c1,), 0.1),
        "g1": 1.0 + n(ks[2], (c1,), 0.1),       "be1": n(ks[3], (c1,), 0.1),
        "w2": n(ks[4], (c1, c1, 3), 0.2),       "b2": n(ks[5], (c1,), 0.1),
        "g2": 1.0 + n(ks[6], (c1,), 0.1),       "be2": n(ks[7], (c1,), 0.1),
        "w3": n(ks[8], (c3, c1), 0.2),          "b3": n(ks[9], (c3,), 0.1),
        "g3": 1.0 + n(ks[10], (c3,), 0.1),      "be3": n(ks[11], (c3,), 0.1),
    }


if __name__ == "__main__":
    # Small shapes consistent with the module: the identity skip requires
    # in_channels == out_channels * expansion.
    N, L = 2, 16
    out_channels = 4
    in_channels = out_channels * 4        # 16

    key = jax.random.PRNGKey(0)
    kx, kp = jax.random.split(key)
    x = jax.random.normal(kx, (N, in_channels, L), jnp.float32)
    params = _init_params(kp, in_channels, out_channels)

    ref = _reference_forward(x, params)

    # Exact-math configuration (f32 MXU operands): strict check vs reference.
    lengths = []
    out = encoder_bottleneck_forward(x, params, lengths, compute_dtype=jnp.float32)
    out = jax.block_until_ready(out)
    assert out.shape == (N, in_channels, L)
    assert lengths == [L]
    err = float(jnp.max(jnp.abs(out - ref)))
    if err > 1e-3:
        raise SystemExit(f"f32 mismatch: max abs err = {err}")

    # bf16 MXU-operand / bf16-intermediate configuration (the perf path): loose check.
    out_bf = encoder_bottleneck_forward(x, params, [], compute_dtype=jnp.bfloat16)
    out_bf = jax.block_until_ready(out_bf)
    err_bf = float(jnp.max(jnp.abs(out_bf.astype(jnp.float32) - ref)))
    if not bool(jnp.all(jnp.isfinite(out_bf))) or err_bf > 0.5:
        raise SystemExit(f"bf16 mismatch too large: max abs err = {err_bf}")

    print("KERNEL_OK")
</pallas_src>

<mosaic_0001>
module attributes {stable_mosaic.version = 11 : i64} {
  func.func @kern(%arg0: memref<8x128xf32, #tpu.memory_space<vmem>>, %arg1: memref<8x128xf32, #tpu.memory_space<vmem>>) attributes {dimension_semantics = [], scalar_prefetch = 0 : i64, scratch_operands = 0 : i64, tpu.core_type = #tpu.core_type<tc>} {
    %c0 = arith.constant 0 : index
    %c0_0 = arith.constant 0 : index
    %0 = vector.load %arg0[%c0, %c0_0] : memref<8x128xf32, #tpu.memory_space<vmem>>, vector<8x128xf32>
    %c1_i32 = arith.constant 1 : i32
    %1 = tpu.dynamic_rotate %0 by %c1_i32 dim 1 : vector<8x128xf32>, i32 -> vector<8x128xf32>
    %c0_1 = arith.constant 0 : index
    %c0_2 = arith.constant 0 : index
    %2 = vector.load %arg1[%c0_1, %c0_2] : memref<8x128xf32, #tpu.memory_space<vmem>>, vector<8x128xf32>
    tpu.vector_store %arg1[%c0_1, %c0_2], %1 {strides = array<i32>} : memref<8x128xf32, #tpu.memory_space<vmem>>, vector<8x128xf32>,
    return
  }
}

</mosaic_0001>

<bundles_post_ra>
// kernel: tpu_custom_call.1
= control target key start
LH: loop header
LB: loop body
LE: loop exit
PB: predicated region body
PF: predicated region fallthrough
CT: control target
= control target key end

     0   :  { %6 = vsyncpa [#allocation3], 0  ;;  %s106_s0 = inlined_call_operand.hbm [shape: f32[8,128], index: 0, kind: input, shape index: {}]   ;;  %s107_s1 = inlined_call_operand.hbm [shape: f32[8,128], index: 1, kind: output, shape index: {}]  }
   0x1   :  { %7 = vsyncpa [#allocation4], 0  ;;  %s87_s6 = smov [#allocation2]  }
   0x2   :  { %s14_s7 = sshll.u32 %s87_s6, 4  ;;  %s15_s7 = int_to_ptr.vmem [resolvable:$true] %s14_s7 }
   0x3   :  { %s51_s8 = scalar_lea.vmem %s15_s7, 128  ;;  %p56_p1 = scmp.lt.s32.totalorder %s15_s7, %s15_s7 }
   0x4   :  { %p52_p0 = scmp.ne.s32.totalorder %s15_s7, %s51_s8  ;;  %p57_p2 = scmp.lt.s32.totalorder %s51_s8, %s51_s8 }
   0x6   :  { %p58_p3 = por %p57_p2, %p56_p1 }
   0x8   :  { %p59_p4 = pnand %p58_p3, %p52_p0 }
   0xa   :  { %62 = shalt.err (!%p59_p4)
}
   0xb   :  { %17 = dma.hbm_to_vmem [thread:$0]  %s106_s0, 128, %s15_s7, [#allocation3]  }
   0xc   :  { %83 = dma.done.wait [#allocation3], 128  }
   0xd   :  { %84 = vsyncadd [#allocation3], 4294967168  ;;  %v21_v0 = vld [vmem:[#allocation2] sm:$0xff]  ;;  %s88_s11 = smov 1   ;;  %s89_s12 = smov [#allocation5]  }
   0xe   :  { %22 = vrot.lane.b32.xlu0 %v21_v0, %s88_s11  ;;  %s31_s13 = sshll.u32 %s89_s12, 4  ;;  %s32_s13 = int_to_ptr.vmem [resolvable:$true] %s31_s13 }
   0xf   :  { %s63_s14 = scalar_lea.vmem %s32_s13, 128  ;;  %p68_p6 = scmp.lt.s32.totalorder %s32_s13, %s32_s13 }
  0x10   :  { %p64_p5 = scmp.ne.s32.totalorder %s32_s13, %s63_s14  ;;  %p69_p7 = scmp.lt.s32.totalorder %s63_s14, %s63_s14 }
  0x12   :  { %p70_p8 = por %p69_p7, %p68_p6 }
  0x14   :  { %p71_p9 = pnand %p70_p8, %p64_p5 }
  0x80   :  { %v23_v1 = vpop.permute.xlu0 %22 }
  0x81   :  { %24 = vst [vmem:[#allocation5] sm:$0xff] %v23_v1 }
  0x82   :  { %74 = shalt.err (!%p71_p9)
}
  0x83   :  { %34 = dma.vmem_to_hbm [thread:$0]  %s32_s13, 128, %s107_s1, [#allocation4]  }
  0x84   :  { %85 = dma.done.wait [#allocation4], 128  }
  0x85   :  { %86 = vsyncadd [#allocation4], 4294967168 }
  0x86   :  { %38 = vsyncpa [#allocation3], 1 }
  0x87   :  { %39 = vsyncpa [#allocation4], 1 }

</bundles_post_ra>
